<compile_context>
chip_gen: v7x
topology: tpu7x:2x2x1
jax: 0.10.0
libtpu: 0.0.40
codegen_flags: <defaults>
</compile_context>

<pallas_src>
import functools

import jax
import jax.numpy as jnp
import numpy as np
from jax import lax
from jax.experimental import pallas as pl
from jax.experimental.pallas import tpu as pltpu

ALPHA = 0.1  # matches self.alpha in the module


def _round_up(x, m):
    return (x + m - 1) // m * m


def _matmul_kernel(w_ref, p_ref, out_ref):
    # One MXU matmul with f32 accumulation, stored straight to the lane-dense
    # (C_pad, tm) output tile.  Lateral mixing and bias are already folded
    # into w_ref / p_ref by the wrapper.
    out_ref[...] = jnp.dot(
        w_ref[...], p_ref[...], preferred_element_type=jnp.float32
    ).astype(out_ref.dtype)


def _lateral_transfer_matrix(lateral, c_out):
    """T such that y_final = T @ y_conv for the sequential in-place update
       y[i] += (ALPHA / c_out) * sum_j lateral[i, j] * y[j]  (i = 0..c_out-1,
       each step seeing the already-updated channels < i)."""
    def body(i, T):
        row = jnp.dot(lateral[i, :], T, precision=lax.Precision.HIGHEST)  # (c_out,)
        return T.at[i, :].add((ALPHA / c_out) * row)

    return lax.fori_loop(0, c_out, body, jnp.eye(c_out, dtype=jnp.float32))


def conv2d_with_lateral(x, weight, bias, lateral, *, learned=True,
                        lateral_mode=False, tm=None, use_bf16=False):
    """Forward pass of Conv2DWithLateralFeatures.

    x: (N, Cin, H, W) f32, weight: (Cout, Cin, KH, KW), bias: (Cout,),
    lateral: (Cout, Cout).  Returns (N, Cout, OH, OW).
    """
    N, C_in, H, W = x.shape
    C_out, _, KH, KW = weight.shape
    OH, OW = H - KH + 1, W - KW + 1
    K = C_in * KH * KW
    M = N * OH * OW

    # --- im2col^T: patches built directly in the final (K, M) layout --------
    # K ordering (cin, kh, kw) matches PyTorch's weight.reshape(Cout, Cin*KH*KW).
    # TODO(synk): for large H/W (esp. v5e) replace the materialized im2col
    # (KH*KW-fold HBM inflation) with an in-kernel NHWC conv using halo'd
    # output-row tiles and KH*KW small matmuls of the folded weight.
    cols = [x[:, :, di:di + OH, dj:dj + OW] for di in range(KH) for dj in range(KW)]
    p = jnp.stack(cols, axis=0)                 # (KH*KW, N, Cin, OH, OW)
    p = p.transpose(2, 0, 1, 3, 4)              # (Cin, KH*KW, N, OH, OW)
    patches_t = p.reshape(K, M).astype(jnp.float32)          # (K, M)

    # --- fold lateral recurrence + bias into the weight matrix --------------
    w_flat = weight.reshape(C_out, K).astype(jnp.float32)    # (Cout, K)
    b_vec = bias.astype(jnp.float32)                         # (Cout,)
    if learned and not lateral_mode:
        T = _lateral_transfer_matrix(lateral.astype(jnp.float32), C_out)
        w_flat = jnp.dot(T, w_flat, precision=lax.Precision.HIGHEST)
        b_vec = jnp.dot(T, b_vec, precision=lax.Precision.HIGHEST)
    # TODO(synk): lateral_mode=True host-side stat collection (numpy min/max
    # normalization, lateral_storage append, corrcoef in process_lateral) is
    # stateful host code with no Pallas equivalent; in that mode we just return
    # the conv output (matching the tensor the PyTorch forward returns).

    # Bias folded into the contraction: extra ones-row in patches^T, extra
    # bias-column in the weight matrix (lives inside the 8-aligned K padding).
    w_aug = jnp.concatenate([w_flat, b_vec[:, None]], axis=1)   # (Cout, K+1)

    # --- padding / tiling ----------------------------------------------------
    C_pad = _round_up(C_out, 8)        # Cout on the SUBLANE axis: pad to 8 only
    K_pad = _round_up(K + 1, 8)        # contraction axis: 8-aligned, NOT 128
    if tm is None:
        # >= 2 grid steps whenever there is enough work (v7x 2-TC sharding),
        # capped at 2048 lanes/tile for HBM-roofline efficiency; tiny M still
        # collapses to a single 128-lane tile.
        tm = min(2048, _round_up(max((M + 1) // 2, 1), 128))
    M_pad = _round_up(M, tm)

    ones_row = jnp.ones((1, M), jnp.float32)
    p_aug = jnp.concatenate([patches_t, ones_row], axis=0)      # (K+1, M)
    p_p = jnp.pad(p_aug, ((0, K_pad - (K + 1)), (0, M_pad - M)))
    w_p = jnp.pad(w_aug, ((0, C_pad - C_out), (0, K_pad - (K + 1))))

    if use_bf16:
        # Optional (v6e/v7x): halves the dominant patch-read HBM traffic;
        # accumulation stays f32.  Off by default to hold the 1e-4 tolerance.
        p_p = p_p.astype(jnp.bfloat16)
        w_p = w_p.astype(jnp.bfloat16)

    out_t = pl.pallas_call(
        _matmul_kernel,
        out_shape=jax.ShapeDtypeStruct((C_pad, M_pad), jnp.float32),
        grid_spec=pltpu.PrefetchScalarGridSpec(
            num_scalar_prefetch=0,
            grid=(M_pad // tm,),
            in_specs=[
                pl.BlockSpec((C_pad, K_pad), lambda i: (0, 0)),  # folded W+bias (resident)
                pl.BlockSpec((K_pad, tm), lambda i: (0, i)),     # patches^T tile
            ],
            out_specs=pl.BlockSpec((C_pad, tm), lambda i: (0, i)),
        ),
        compiler_params=pltpu.CompilerParams(
            dimension_semantics=("parallel",),  # independent M tiles -> v7x 2 TCs
        ),
    )(w_p, p_p)

    # Strip padding and go back to NCHW.
    out = out_t[:C_out, :M]                                   # (Cout, N*OH*OW)
    out = out.reshape(C_out, N, OH, OW).transpose(1, 0, 2, 3)  # (N, Cout, OH, OW)
    return out.astype(x.dtype)


def _reference(x, weight, bias, lateral, learned=True):
    y = lax.conv_general_dilated(
        x, weight, window_strides=(1, 1), padding="VALID",
        dimension_numbers=("NCHW", "OIHW", "NCHW"),
        precision=lax.Precision.HIGHEST)
    y = y + bias.reshape(1, -1, 1, 1)
    if learned:
        c_out = weight.shape[0]
        for i in range(c_out):
            y = y.at[:, i].add(
                ALPHA * jnp.mean(lateral[i].reshape(1, -1, 1, 1) * y, axis=1))
    return y


if __name__ == "__main__":
    # Small shapes consistent with the module: Conv2d(in=4, out=8, k=3) on a
    # (2, 4, 16, 16) input -> output (2, 8, 14, 14).
    N, C_in, H, W = 2, 4, 16, 16
    C_out, KH, KW = 8, 3, 3

    key = jax.random.PRNGKey(0)
    kx, kw, kb = jax.random.split(key, 3)
    x = jax.random.normal(kx, (N, C_in, H, W), dtype=jnp.float32)
    fan_in = C_in * KH * KW
    weight = jax.random.normal(kw, (C_out, C_in, KH, KW), dtype=jnp.float32) / np.sqrt(fan_in)
    bias = jax.random.normal(kb, (C_out,), dtype=jnp.float32) * 0.1
    lateral = jnp.ones((C_out, C_out), dtype=jnp.float32)  # __init__ uses torch.ones

    fwd = jax.jit(functools.partial(conv2d_with_lateral, learned=True, lateral_mode=False))
    y = fwd(x, weight, bias, lateral)
    y = jax.block_until_ready(y)

    y_ref = _reference(x, weight, bias, lateral, learned=True)
    np.testing.assert_allclose(np.asarray(y), np.asarray(y_ref), rtol=1e-4, atol=1e-4)

    print("KERNEL_OK")
</pallas_src>

<mosaic_0001>
module attributes {stable_mosaic.version = 11 : i64} {
  func.func @_matmul_kernel(%arg0: i32, %arg1: memref<8x40xf32, #tpu.memory_space<vmem>>, %arg2: memref<40x256xf32, #tpu.memory_space<vmem>>, %arg3: memref<8x256xf32, #tpu.memory_space<vmem>>) attributes {dimension_semantics = [#tpu.dimension_semantics<parallel>], iteration_bounds = array<i64: 2>, scalar_prefetch = 0 : i64, scratch_operands = 0 : i64, tpu.core_type = #tpu.core_type<tc>, window_params = [{pipeline_mode = #tpu.pipeline_mode<synchronous>, transform_indices = @transform_0, window_bounds = array<i64: 8, 40>}, {transform_indices = @transform_1, window_bounds = array<i64: 40, 256>}, {transform_indices = @transform_2, window_bounds = array<i64: 8, 256>}]} {
    %c0 = arith.constant 0 : index
    %c0_0 = arith.constant 0 : index
    %0 = vector.load %arg1[%c0, %c0_0] : memref<8x40xf32, #tpu.memory_space<vmem>>, vector<8x40xf32>
    %c0_1 = arith.constant 0 : index
    %c0_2 = arith.constant 0 : index
    %1 = vector.load %arg2[%c0_1, %c0_2] : memref<40x256xf32, #tpu.memory_space<vmem>>, vector<40x256xf32>
    %cst = arith.constant dense<0.000000e+00> : vector<8x256xf32>
    %2 = tpu.matmul %0, %1, %cst {dimension_numbers = #tpu.dot_dimension_numbers<[1], [0], [0], [1], [0, 0, 1, 1], [], []>} : vector<8x40xf32>, vector<40x256xf32>, vector<8x256xf32> -> vector<8x256xf32>
    %c0_3 = arith.constant 0 : index
    %c0_4 = arith.constant 0 : index
    %3 = vector.load %arg3[%c0_3, %c0_4] : memref<8x256xf32, #tpu.memory_space<vmem>>, vector<8x256xf32>
    tpu.vector_store %arg3[%c0_3, %c0_4], %2 {strides = array<i32>} : memref<8x256xf32, #tpu.memory_space<vmem>>, vector<8x256xf32>,
    return
  }
  func.func @transform_0(%arg0: i32) -> (i32, i32) {
    %c0_i32 = arith.constant 0 : i32
    %c0_i32_0 = arith.constant 0 : i32
    %c0_i32_1 = arith.constant 0 : i32
    return %c0_i32, %c0_i32_0 : i32, i32
  }
  func.func @transform_1(%arg0: i32) -> (i32, i32) {
    %c0_i32 = arith.constant 0 : i32
    %c0_i32_0 = arith.constant 0 : i32
    return %c0_i32, %arg0 : i32, i32
  }
  func.func @transform_2(%arg0: i32) -> (i32, i32) {
    %c0_i32 = arith.constant 0 : i32
    %c0_i32_0 = arith.constant 0 : i32
    return %c0_i32, %arg0 : i32, i32
  }
}

</mosaic_0001>

<bundles_post_ra>
// kernel: conv2d_with_lateral.1
= control target key start
LH: loop header
LB: loop body
LE: loop exit
PB: predicated region body
PF: predicated region fallthrough
CT: control target
= control target key end

     0   :  { %s422_s9 = smov 0   ;;  %s424_s10 = smov 0   ;;  %s477_s0 = inlined_call_operand.vmem [shape: f32[8,40], index: 0, kind: input, shape index: {}]   ;;  %s478_s1 = inlined_call_operand.vmem [shape: f32[40,512], index: 1, kind: input, shape index: {}]   ;;  %s479_s2 = inlined_call_operand.vmem [shape: f32[8,512], index: 2, kind: output, shape index: {}]  }
   0x1   :  { %s426_s11 = smov 0  }
   0x2 LB: > { %s334_s12 = sadd.s32 4294967295, %s404_s11   ;;  %s439_s13 = sadd.s32 1, %s404_s11   ;;  %s404_s11 = sphi %s426_s11, %s482_s11   ;;  %s400_s10 = sphi %s424_s10, %s481_s10   ;;  %s396_s9 = sphi %s422_s9, %s480_s9  }
   0x3   : > { %s37_s14 = ssub.s32 %s404_s11, %s439_s13  ;;  %s40_s15 = sadd.s32 1, %s400_s10 }
   0x4   : > { %p38_p0 = scmp.eq.s32.totalorder %s37_s14, 0  ;;  %p47_p1 = scmp.ne.s32.totalorder %s400_s10, %s396_s9 }
   0x5   : > { %p48_p2 = scmp.eq.s32.totalorder %s404_s11, 0  ;;  %p337_p4 = scmp.ge.s32.totalorder %s404_s11, 2 }
   0x6   : > { %s448_s16 = scalar_select %p38_p0, %s400_s10, %s40_s15  }
   0x7   : > { %p49_p3 = por %p48_p2, %p47_p1  ;;  %102 = sbr.rel (%p337_p4) target bundleno = 23 (0x17), region = 20 }
   0xe   : > { %105 = sbr.rel (!%p49_p3) target bundleno = 23 (0x17), region = 24  ;;  %s107_s17 = sand.u32 (%p49_p3), 1, %s400_s10  }
   0xf   : > { %s346_s18 = sshll.u32 (%p49_p3), %s404_s11, 4  ;;  %s355_s19 = smul.u32 (%p49_p3), 80, %s107_s17 }
  0x10   : > { %s112_s22 = scalar_lea.vmem (%p49_p3), %s478_s1, %s346_s18 }
  0x11   : > { %v125_v0 = vld [vmem:[%s112_s22] sm:$0xff] (%p49_p3)  ;;  %v127_v1 = vld [vmem:[%s112_s22 + $0x8] sm:$0xff] (%p49_p3)  ;;  %s109_s23 = scalar_lea.vmem (%p49_p3), [#allocation2], %s355_s19 }
  0x12   : > { %v129_v2 = vld [vmem:[%s112_s22 + $0x20] sm:$0xff] (%p49_p3)  ;;  %v131_v3 = vld [vmem:[%s112_s22 + $0x28] sm:$0xff] (%p49_p3)  ;;  %126 = vst [vmem:[%s109_s23] sm:$0xff] (%p49_p3), %v125_v0  ;;  %128 = vst [vmem:[%s109_s23 + $0x8] sm:$0xff] (%p49_p3), %v127_v1 }
  0x13   : > { %v133_v4 = vld [vmem:[%s112_s22 + $0x40] sm:$0xff] (%p49_p3)  ;;  %v135_v5 = vld [vmem:[%s112_s22 + $0x48] sm:$0xff] (%p49_p3)  ;;  %130 = vst [vmem:[%s109_s23 + $0x10] sm:$0xff] (%p49_p3), %v129_v2  ;;  %132 = vst [vmem:[%s109_s23 + $0x18] sm:$0xff] (%p49_p3), %v131_v3 }
  0x14   : > { %134 = vst [vmem:[%s109_s23 + $0x20] sm:$0xff] (%p49_p3), %v133_v4  ;;  %136 = vst [vmem:[%s109_s23 + $0x28] sm:$0xff] (%p49_p3), %v135_v5  ;;  %v137_v6 = vld [vmem:[%s112_s22 + $0x60] sm:$0xff] (%p49_p3)  ;;  %v139_v7 = vld [vmem:[%s112_s22 + $0x68] sm:$0xff] (%p49_p3) }
  0x15   : > { %v141_v8 = vld [vmem:[%s112_s22 + $0x80] sm:$0xff]  ;;  %138 = vst [vmem:[%s109_s23 + $0x30] sm:$0xff] %v137_v6  ;;  %140 = vst [vmem:[%s109_s23 + $0x38] sm:$0xff] %v139_v7  ;;  %v143_v9 = vld [vmem:[%s112_s22 + $0x88] sm:$0xff] }
  0x16   : > { %142 = vst [vmem:[%s109_s23 + $0x40] sm:$0xff] %v141_v8  ;;  %144 = vst [vmem:[%s109_s23 + $0x48] sm:$0xff] %v143_v9 }
  0x17 PF: > { %p340_p5 = scmp.ge.s32.totalorder %s404_s11, 1  ;;  %p149_p6 = scmp.lt.s32.totalorder %s404_s11, 3 }
  0x19   : > { %p150_p7 = pnand %p340_p5, %p149_p6 }
  0x1a   : > { %s156_s24 = sand.u32 (!%p150_p7), 1, %s396_s9   ;;  %v406_v10 = vmov (!%p150_p7), 0.0   ;;  %v184_v25 = vld [vmem:[%s477_s0] sm:$0xff] (!%p150_p7)  ;;  %vm195_vm0 = vcmask (!%p150_p7), 326656   ;;  %s341_s29 = sshll.u32 (!%p150_p7), %s334_s12, 1 }
  0x1b   : > { %153 = sbr.rel (%p150_p7) target bundleno = 258 (0x102), region = 47  ;;  %263 = vmatprep.mubr.f32.mxu0 (!%p150_p7), %v406_v10  ;;  %p179_p8 = scmp.lt.s32.totalorder (!%p150_p7), %s341_s29, 3 }
  0x1c   : > { %s356_s25 = smul.u32 (!%p150_p7), 80, %s156_s24 }
  0x1e   : > { %s158_s26 = scalar_lea.vmem (!%p150_p7), [#allocation2], %s356_s25 }
  0x1f   : > { %v186_v11 = vld [vmem:[%s158_s26 + $0x8] sm:$0xff] (!%p150_p7)  ;;  %v188_v12 = vld [vmem:[%s158_s26 + $0x18] sm:$0xff] (!%p150_p7)  ;;  %v185_v13 = vld [vmem:[%s158_s26] sm:$0xff] (!%p150_p7) }
  0x20   : > { %v347_v14 = vpack.c.bf16 (!%p150_p7), %v188_v12, %v186_v11  ;;  %v187_v15 = vld [vmem:[%s158_s26 + $0x10] sm:$0xff] (!%p150_p7)  ;;  %v190_v16 = vld [vmem:[%s158_s26 + $0x28] sm:$0xff] (!%p150_p7)  ;;  %v192_v17 = vld [vmem:[%s158_s26 + $0x38] sm:$0xff] (!%p150_p7) }
  0x21   : > { %v349_v18 = vpack.c.bf16 (!%p150_p7), %v187_v15, %v185_v13  ;;  %v351_v19 = vpack.c.bf16 (!%p150_p7), %v192_v17, %v190_v16  ;;  %v189_v20 = vld [vmem:[%s158_s26 + $0x20] sm:$0xff] (!%p150_p7)  ;;  %v191_v21 = vld [vmem:[%s158_s26 + $0x30] sm:$0xff] (!%p150_p7)  ;;  %v194_v23 = vld [vmem:[%s158_s26 + $0x48] sm:$0xff] (!%p150_p7) }
  0x22   : > { %348 = vmatprep.subr.bf16.mxu0 %v347_v14  ;;  %v353_v22 = vpack.c.bf16 %v191_v21, %v189_v20  ;;  %v193_v24 = vld [vmem:[%s158_s26 + $0x40] sm:$0xff]  ;;  %s484_s29 = smov (!%p179_p8, %s341_s29), 3 }
  0x23   : > { %350 = vmatpush1.bf16.msra.mxu0 %v349_v18  ;;  %s342_s30 = sshll.u32 %s484_s29, 3 }
  0x24   : > { %352 = vmatprep.subr.bf16.mxu0 %v351_v19  ;;  %s182_s5 = scalar_lea.vmem %s479_s2, %s342_s30 }
  0x27   : > { %354 = vmatpush1.bf16.msra.mxu0 %v353_v22 }
  0x28   : > { %207 = vmatprep.subr.mxu0 %v194_v23 }
  0x2b   : > { %208 = vmatpush1.msra.mxu0 %v193_v24 }
  0x2c   : > { %343 = vmatmul.mubr.msk.f32.vlgmr.msra.gmra.mrb[0].mxu0 %vm195_vm0, %v184_v25 }
  0xff   : > { %v265_v26 = vpop.f32.mrb[0].mxu0 }
 0x100   : > { %270 = vst [vmem:[%s182_s5] sm:$0xff] %v265_v26  ;;  %v267_v27 = vpop.f32.mrb[1].mxu0 }
 0x101   : > { %271 = vst [vmem:[%s182_s5 + $0x8] sm:$0xff] %v267_v27 }
 0x102 PF: > { %p9_p9 = scmp.ge.s32.totalorder %s439_s13, 4   ;;  %s480_s9 = smov %s400_s10 }
 0x103   : > { %s481_s10 = smov %s448_s16  ;;  %s482_s11 = smov %s439_s13 }
 0x104   :  { %11 = sbr.rel (!%p9_p9) target bundleno = 2 (0x2), region = 86 }

</bundles_post_ra>
